<compile_context>
chip_gen: v5e
topology: v5e:2x2
jax: 0.10.0
libtpu: 0.0.40
codegen_flags: <defaults>
</compile_context>

<pallas_src>
import functools

import jax
import jax.numpy as jnp
from jax import lax
from jax.experimental import pallas as pl
from jax.experimental.pallas import tpu as pltpu

LANES = 128
SUBLANES = 8
# ~2 MiB per input block: big enough to sit near the HBM roofline, small
# enough that 2 inputs x 2 pipeline buffers (~8 MiB for f32) fit every
# generation's scoped VMEM with headroom (v5e 16 MiB raised to 32 below).
TARGET_BLOCK_BYTES = 2 * 1024 * 1024


def _round_up(x, m):
    return (x + m - 1) // m * m


def _smooth_l1_partial_kernel(x_ref, y_ref, o_ref, *, rows, block_rows,
                              n_inner, need_mask):
    c = pl.program_id(0)   # "parallel" axis (per-core partial)
    i = pl.program_id(1)   # "arbitrary" reduction axis

    # o_ref is one (8,128) accumulator tile per outer grid slot; it stays
    # resident in VMEM across the inner axis.
    @pl.when(i == 0)
    def _():
        o_ref[...] = jnp.zeros_like(o_ref)

    # Upcast in-vreg (free VPU work) instead of materializing f32 copies in HBM.
    x = x_ref[...].astype(jnp.float32)
    y = y_ref[...].astype(jnp.float32)
    d = x - y
    ad = jnp.abs(d)
    # smooth_l1 (beta=1): 0.5*d^2 if |d| < 1 else |d| - 0.5
    elem = jnp.where(ad < 1.0, 0.5 * d * d, ad - 0.5)

    if need_mask:
        # Static decision: the last block overhangs the array, so mask rows
        # beyond `rows` (their contents are undefined).  Cheap VPU cmp+select.
        gblk = c * n_inner + i
        row_ids = lax.broadcasted_iota(jnp.int32, (block_rows, LANES), 0)
        global_rows = gblk * block_rows + row_ids
        elem = jnp.where(global_rows < rows, elem, 0.0)

    # Reduce the block to one vreg-shaped (8,128) partial with pure VPU adds;
    # the expensive cross-lane reduce happens once, in the wrapper.
    partial = elem.reshape(block_rows // SUBLANES, SUBLANES, LANES).sum(axis=0)
    o_ref[...] += partial


def smooth_l1_loss(x, label):
    assert x.shape == label.shape
    n_elems = x.size

    xf = x.reshape(-1)
    yf = label.reshape(-1)

    # Minimal padding: only to a 128-lane multiple and only when ragged.
    # Zero-padding both inputs contributes exactly zero loss.
    padded = _round_up(n_elems, LANES)
    pad = padded - n_elems
    if pad:
        xf = jnp.pad(xf, (0, pad))
        yf = jnp.pad(yf, (0, pad))

    rows = padded // LANES
    x2 = xf.reshape(rows, LANES)
    y2 = yf.reshape(rows, LANES)

    itemsize = max(x.dtype.itemsize, label.dtype.itemsize)
    # Respect native sublane tiling for packed dtypes (f32:8, bf16:16, i8:32).
    sub_mult = max(SUBLANES, 32 // itemsize)
    max_rows = max(
        sub_mult,
        (TARGET_BLOCK_BYTES // (LANES * itemsize)) // sub_mult * sub_mult,
    )
    block_rows = min(_round_up(rows, sub_mult), max_rows)
    total_blocks = pl.cdiv(rows, block_rows)

    # Split blocks across the two v7x TensorCores when they divide evenly;
    # on 1-TC chips the outer axis simply runs sequentially.
    n_outer = 2 if (total_blocks % 2 == 0 and total_blocks >= 2) else 1
    n_inner = total_blocks // n_outer
    need_mask = (rows % block_rows) != 0

    kernel = functools.partial(
        _smooth_l1_partial_kernel,
        rows=rows, block_rows=block_rows, n_inner=n_inner, need_mask=need_mask)

    out_bytes = n_outer * SUBLANES * LANES * 4
    cost = pl.CostEstimate(
        flops=5 * n_elems,
        transcendentals=0,
        bytes_accessed=int(x.nbytes) + int(label.nbytes) + out_bytes,
    )

    partials = pl.pallas_call(
        kernel,
        out_shape=jax.ShapeDtypeStruct((n_outer * SUBLANES, LANES), jnp.float32),
        grid_spec=pltpu.PrefetchScalarGridSpec(
            num_scalar_prefetch=0,
            grid=(n_outer, n_inner),
            in_specs=[
                pl.BlockSpec((block_rows, LANES),
                             lambda c, i: (c * n_inner + i, 0)),
                pl.BlockSpec((block_rows, LANES),
                             lambda c, i: (c * n_inner + i, 0)),
            ],
            out_specs=pl.BlockSpec((SUBLANES, LANES), lambda c, i: (c, 0)),
        ),
        compiler_params=pltpu.CompilerParams(
            dimension_semantics=("parallel", "arbitrary"),
            vmem_limit_bytes=32 * 1024 * 1024,
        ),
        cost_estimate=cost,
    )(x2, y2)

    # Single final cross-lane reduce (tiny) + mean.
    return (jnp.sum(partials) / jnp.float32(n_elems)).astype(jnp.float32)


def _ref_smooth_l1(x, label):
    d = x.astype(jnp.float32) - label.astype(jnp.float32)
    ad = jnp.abs(d)
    return jnp.mean(jnp.where(ad < 1.0, 0.5 * d * d, ad - 0.5))


if __name__ == "__main__":
    key = jax.random.PRNGKey(0)

    # Test 1: lane-aligned NCHW shape (no padding path).
    k1, k2, k3, k4 = jax.random.split(key, 4)
    x = jax.random.normal(k1, (2, 4, 16, 16), dtype=jnp.float32)
    label = jax.random.normal(k2, (2, 4, 16, 16), dtype=jnp.float32)
    loss = smooth_l1_loss(x, label)
    jax.block_until_ready(loss)
    ref = _ref_smooth_l1(x, label)
    assert jnp.allclose(loss, ref, atol=1e-5, rtol=1e-5), (loss, ref)

    # Test 2: ragged element count (exercises minimal pad + in-kernel row mask).
    xr = jax.random.normal(k3, (3, 5, 7, 11), dtype=jnp.float32)
    lr = jax.random.normal(k4, (3, 5, 7, 11), dtype=jnp.float32)
    loss_r = smooth_l1_loss(xr, lr)
    jax.block_until_ready(loss_r)
    ref_r = _ref_smooth_l1(xr, lr)
    assert jnp.allclose(loss_r, ref_r, atol=1e-5, rtol=1e-5), (loss_r, ref_r)

    print("KERNEL_OK")
</pallas_src>

<mosaic_0001>
module attributes {stable_mosaic.version = 11 : i64} {
  func.func @_smooth_l1_partial_kernel(%arg0: i32, %arg1: i32, %arg2: memref<16x128xf32, #tpu.memory_space<vmem>>, %arg3: memref<16x128xf32, #tpu.memory_space<vmem>>, %arg4: memref<8x128xf32, #tpu.memory_space<vmem>>) attributes {dimension_semantics = [#tpu.dimension_semantics<parallel>, #tpu.dimension_semantics<arbitrary>], iteration_bounds = array<i64: 1, 1>, scalar_prefetch = 0 : i64, scratch_operands = 0 : i64, tpu.core_type = #tpu.core_type<tc>, window_params = [{transform_indices = @transform_0, window_bounds = array<i64: 16, 128>}, {transform_indices = @transform_1, window_bounds = array<i64: 16, 128>}, {transform_indices = @transform_2, window_bounds = array<i64: 8, 128>}]} {
    %c0_i32 = arith.constant 0 : i32
    %0 = arith.cmpi eq, %arg1, %c0_i32 : i32
    %1 = arith.extui %0 : i1 to i32
    %c0_i32_0 = arith.constant 0 : i32
    %2 = arith.cmpi ne, %1, %c0_i32_0 : i32
    scf.if %2 {
      %cst_11 = arith.constant 0.000000e+00 : f32
      %20 = vector.broadcast %cst_11 : f32 to vector<8x128xf32>
      %c0_12 = arith.constant 0 : index
      %c0_13 = arith.constant 0 : index
      %21 = vector.load %arg4[%c0_12, %c0_13] : memref<8x128xf32, #tpu.memory_space<vmem>>, vector<8x128xf32>
      tpu.vector_store %arg4[%c0_12, %c0_13], %20 {strides = array<i32>} : memref<8x128xf32, #tpu.memory_space<vmem>>, vector<8x128xf32>,
    } else {
    }
    %c0 = arith.constant 0 : index
    %c0_1 = arith.constant 0 : index
    %3 = vector.load %arg2[%c0, %c0_1] : memref<16x128xf32, #tpu.memory_space<vmem>>, vector<16x128xf32>
    %c0_2 = arith.constant 0 : index
    %c0_3 = arith.constant 0 : index
    %4 = vector.load %arg3[%c0_2, %c0_3] : memref<16x128xf32, #tpu.memory_space<vmem>>, vector<16x128xf32>
    %5 = arith.subf %3, %4 : vector<16x128xf32>
    %6 = math.absf %5 : vector<16x128xf32>
    %cst = arith.constant 1.000000e+00 : f32
    %7 = vector.broadcast %cst : f32 to vector<16x128xf32>
    %8 = arith.cmpf olt, %6, %7 : vector<16x128xf32>
    %cst_4 = arith.constant 5.000000e-01 : f32
    %9 = vector.broadcast %cst_4 : f32 to vector<16x128xf32>
    %10 = arith.mulf %9, %5 : vector<16x128xf32>
    %11 = arith.mulf %10, %5 : vector<16x128xf32>
    %cst_5 = arith.constant 5.000000e-01 : f32
    %12 = vector.broadcast %cst_5 : f32 to vector<16x128xf32>
    %13 = arith.subf %6, %12 : vector<16x128xf32>
    %14 = arith.select %8, %11, %13 : vector<16x128xi1>, vector<16x128xf32>
    %15 = vector.shape_cast %14 : vector<16x128xf32> to vector<2x8x128xf32>
    %cst_6 = arith.constant dense<0.000000e+00> : vector<8x128xf32>
    %16 = vector.multi_reduction <add>, %15, %cst_6 [0] : vector<2x8x128xf32> to vector<8x128xf32>
    %c0_7 = arith.constant 0 : index
    %c0_8 = arith.constant 0 : index
    %17 = vector.load %arg4[%c0_7, %c0_8] : memref<8x128xf32, #tpu.memory_space<vmem>>, vector<8x128xf32>
    %18 = arith.addf %17, %16 : vector<8x128xf32>
    %c0_9 = arith.constant 0 : index
    %c0_10 = arith.constant 0 : index
    %19 = vector.load %arg4[%c0_9, %c0_10] : memref<8x128xf32, #tpu.memory_space<vmem>>, vector<8x128xf32>
    tpu.vector_store %arg4[%c0_9, %c0_10], %18 {strides = array<i32>} : memref<8x128xf32, #tpu.memory_space<vmem>>, vector<8x128xf32>,
    return
  }
  func.func @transform_0(%arg0: i32, %arg1: i32) -> (i32, i32) {
    %c1_i32 = arith.constant 1 : i32
    %0 = arith.muli %arg0, %c1_i32 : i32
    %1 = arith.addi %0, %arg1 : i32
    %c0_i32 = arith.constant 0 : i32
    %c0_i32_0 = arith.constant 0 : i32
    return %1, %c0_i32 : i32, i32
  }
  func.func @transform_1(%arg0: i32, %arg1: i32) -> (i32, i32) {
    %c1_i32 = arith.constant 1 : i32
    %0 = arith.muli %arg0, %c1_i32 : i32
    %1 = arith.addi %0, %arg1 : i32
    %c0_i32 = arith.constant 0 : i32
    %c0_i32_0 = arith.constant 0 : i32
    return %1, %c0_i32 : i32, i32
  }
  func.func @transform_2(%arg0: i32, %arg1: i32) -> (i32, i32) {
    %c0_i32 = arith.constant 0 : i32
    %c0_i32_0 = arith.constant 0 : i32
    return %arg0, %c0_i32 : i32, i32
  }
}

</mosaic_0001>

<bundles_post_ra>
// kernel: tpu_custom_call.1
= control target key start
LH: loop header
LB: loop body
LE: loop exit
PB: predicated region body
PF: predicated region fallthrough
CT: control target
= control target key end

     0   :  { %7 = vsyncpa [#allocation3], 0  ;;  %s216_s0 = inlined_call_operand.hbm [shape: f32[16,128], index: 0, kind: input, shape index: {}]   ;;  %s217_s1 = inlined_call_operand.hbm [shape: f32[16,128], index: 1, kind: input, shape index: {}]   ;;  %s218_s2 = inlined_call_operand.hbm [shape: f32[8,128], index: 2, kind: output, shape index: {}]  }
   0x1   :  { %8 = vsyncpa [#allocation6], 0 }
   0x2   :  { %9 = vsyncpa [#allocation4], 0  ;;  %s18_s11 = sshll.u32 %s216_s0, 4  ;;  %s187_s12 = smov [#allocation2]   ;;  %s19_s11 = int_to_ptr.hbm [resolvable:$true] %s18_s11 }
   0x3   :  { %s20_s13 = sshll.u32 %s187_s12, 4  ;;  %s35_s16 = sshll.u32 %s217_s1, 4  ;;  %s21_s13 = int_to_ptr.vmem [resolvable:$true] %s20_s13  ;;  %s36_s16 = int_to_ptr.hbm [resolvable:$true] %s35_s16 }
   0x4   :  { %s188_s17 = smov 128   ;;  %s189_s18 = smov 8  }
   0x5   :  { %26 = dma.hbm_to_vmem [thread:$0]  %s19_s11, 256, %s21_s13, [#allocation3], %s188_s17, %s188_s17, %s189_s18  }
   0x6   :  { %s190_s19 = smov [#allocation5]  }
   0x7   :  { %s37_s20 = sshll.u32 %s190_s19, 4  ;;  %s38_s20 = int_to_ptr.vmem [resolvable:$true] %s37_s20 }
   0x8   :  { %43 = dma.hbm_to_vmem [thread:$0]  %s36_s16, 256, %s38_s20, [#allocation6], %s188_s17, %s188_s17, %s189_s18  }
   0x9   :  { %181 = dma.done.wait [#allocation3], 256  }
   0xa   :  { %182 = vsyncadd [#allocation3], 4294967040 }
   0xb   :  { %183 = dma.done.wait [#allocation6], 256  }
   0xc   :  { %184 = vsyncadd [#allocation6], 4294967040  ;;  %v61_v0 = vld [vmem:[#allocation2] sm:$0xff]  ;;  %v62_v1 = vld [vmem:[#allocation2 + $0x8] sm:$0xff]  ;;  %s191_s0 = smov [#allocation7]   ;;  %s90_s23 = sshll.u32 %s218_s2, 4  ;;  %s91_s23 = int_to_ptr.hbm [resolvable:$true] %s90_s23 }
   0xd   :  { %v63_v2 = vld [vmem:[#allocation5] sm:$0xff]  ;;  %v64_v3 = vld [vmem:[#allocation5 + $0x8] sm:$0xff]  ;;  %s88_s1 = sshll.u32 %s191_s0, 4  ;;  %s89_s1 = int_to_ptr.vmem [resolvable:$true] %s88_s1 }
   0xe   :  { %v65_v4 = vsub.f32 %v61_v0, %v63_v2  ;;  %v66_v5 = vsub.f32 %v62_v1, %v64_v3 }
  0x10   :  { %v67_v6 = vand.u32 2147483647, %v65_v4  ;;  %v71_v7 = vmul.f32 0.5, %v65_v4  ;;  %v68_v8 = vand.u32 2147483647, %v66_v5  ;;  %v72_v9 = vmul.f32 0.5, %v66_v5 }
  0x12   :  { %vm69_vm0 = vcmp.lt.f32.partialorder %v67_v6, 1.0  ;;  %v73_v10 = vmul.f32 %v71_v7, %v65_v4  ;;  %v101_v11 = vadd.f32 -0.5, %v67_v6  ;;  %vm70_vm1 = vcmp.lt.f32.partialorder %v68_v8, 1.0 }
  0x13   :  { %v74_v12 = vmul.f32 %v72_v9, %v66_v5  ;;  %v102_v13 = vadd.f32 -0.5, %v68_v8 }
  0x14   :  { %v77_v14 = vsel %vm69_vm0, %v73_v10, %v101_v11 }
  0x15   :  { %v78_v15 = vsel %vm70_vm1, %v74_v12, %v102_v13 }
  0x16   :  { %v79_v16 = vadd.f32 %v78_v15, %v77_v14 }
  0x18   :  { %82 = vst [vmem:[#allocation7] sm:$0xff] %v79_v16 }
  0x19   :  { %93 = dma.vmem_to_hbm [thread:$0]  %s89_s1, 128, %s91_s23, [#allocation4]  }
  0x1a   :  { %185 = dma.done.wait [#allocation4], 128  }
  0x1b   :  { %186 = vsyncadd [#allocation4], 4294967168 }
  0x1c   :  { %98 = vsyncpa [#allocation3], 1 }
  0x1d   :  { %99 = vsyncpa [#allocation6], 1 }
  0x1e   :  { %100 = vsyncpa [#allocation4], 1 }

</bundles_post_ra>
